<compile_context>
chip_gen: v7x
topology: tpu7x:2x2x1
jax: 0.10.0
libtpu: 0.0.40
codegen_flags: <defaults>
</compile_context>

<pallas_src>
import jax
import jax.numpy as jnp
from jax.experimental import pallas as pl
from jax.experimental.pallas import tpu as pltpu

_LANES = 128
_MAX_TILE_ROWS = 4096            # (4096, 128) f32 block = 2 MiB per buffer
_VMEM_LIMIT = 32 * 1024 * 1024   # 3 arrays x 2 buffers x 2 MiB fits easily


# ----------------------------- generic residual add -------------------------

def _residual_add_kernel(y_ref, x_ref, o_ref):
    # o = fn(x) + x, one (tile_rows, 128) VMEM block per grid step.
    o_ref[...] = y_ref[...] + x_ref[...]


def residual_add(y: jax.Array, x: jax.Array) -> jax.Array:
    """Computes y + x with a Pallas TPU kernel. y and x must match shape/dtype."""
    assert y.shape == x.shape, (y.shape, x.shape)
    assert y.dtype == x.dtype, (y.dtype, x.dtype)
    orig_shape = x.shape
    n = x.size

    # Copy-free lane-dense view when possible; minimal pad otherwise.
    pad = (-n) % _LANES
    yf = jnp.ravel(y)
    xf = jnp.ravel(x)
    if pad:
        # TODO(synk): ragged tail handled by a (copying) pad; only hit when the
        # total element count is not a multiple of 128.
        yf = jnp.pad(yf, (0, pad))
        xf = jnp.pad(xf, (0, pad))

    rows = (n + pad) // _LANES
    y2 = yf.reshape(rows, _LANES)
    x2 = xf.reshape(rows, _LANES)

    # Large fixed block + cdiv grid: Pallas masks the partial last block, so we
    # never degrade to 8-row tiles when `rows` has awkward factors.
    tile_rows = rows if rows <= _MAX_TILE_ROWS else _MAX_TILE_ROWS
    grid = (pl.cdiv(rows, tile_rows),)

    out2 = pl.pallas_call(
        _residual_add_kernel,
        out_shape=jax.ShapeDtypeStruct((rows, _LANES), x.dtype),
        grid_spec=pltpu.PrefetchScalarGridSpec(
            num_scalar_prefetch=0,
            grid=grid,
            in_specs=[
                pl.BlockSpec((tile_rows, _LANES), lambda i: (i, 0)),
                pl.BlockSpec((tile_rows, _LANES), lambda i: (i, 0)),
            ],
            out_specs=pl.BlockSpec((tile_rows, _LANES), lambda i: (i, 0)),
        ),
        # fn(x) is a dead temporary inside the (jitted) forward: write the
        # result in place over it instead of allocating a third HBM buffer.
        input_output_aliases={0: 0},
        compiler_params=pltpu.CompilerParams(
            dimension_semantics=("parallel",),
            vmem_limit_bytes=_VMEM_LIMIT,
        ),
    )(y2, x2)

    if pad:
        return out2.reshape(-1)[:n].reshape(orig_shape)
    return out2.reshape(orig_shape)


# ------------------- fused path: 1x1 conv + residual in one kernel ----------

def _fused_conv1x1_residual_kernel(w_ref, x_ref, o_ref):
    x = x_ref[...]                                         # (C, hw_block)
    y = jnp.dot(w_ref[...], x, preferred_element_type=jnp.float32)
    o_ref[...] = (y + x.astype(jnp.float32)).astype(o_ref.dtype)


def fused_conv1x1_residual(w: jax.Array, x: jax.Array) -> jax.Array:
    """out[n,o,h,w] = sum_c w[o,c] * x[n,c,h,w] + x[n,o,h,w], single Pallas pass."""
    n_batch, c, h, wd = x.shape
    c_out, c_in = w.shape
    assert c_out == c_in == c, (w.shape, x.shape)
    hw = h * wd
    x3 = x.reshape(n_batch, c, hw)          # lane-dense: spatial on lanes

    bytes_per = jnp.dtype(x.dtype).itemsize
    max_lanes = max(_LANES, (2 * 1024 * 1024 // (bytes_per * c)) // _LANES * _LANES)
    hw_block = hw if hw <= max_lanes else max_lanes
    grid = (n_batch, pl.cdiv(hw, hw_block))

    out3 = pl.pallas_call(
        _fused_conv1x1_residual_kernel,
        out_shape=jax.ShapeDtypeStruct((n_batch, c, hw), x.dtype),
        grid_spec=pltpu.PrefetchScalarGridSpec(
            num_scalar_prefetch=0,
            grid=grid,
            in_specs=[
                pl.BlockSpec((c, c), lambda b, j: (0, 0)),
                pl.BlockSpec((None, c, hw_block), lambda b, j: (b, 0, j)),
            ],
            out_specs=pl.BlockSpec((None, c, hw_block), lambda b, j: (b, 0, j)),
        ),
        compiler_params=pltpu.CompilerParams(
            dimension_semantics=("parallel", "parallel"),
            vmem_limit_bytes=_VMEM_LIMIT,
        ),
    )(w, x3)

    return out3.reshape(n_batch, c, h, wd)


# --------------------------------- module ------------------------------------

class Residual:
    """JAX/Pallas port of the PyTorch Residual module: forward(x) = fn(x) + x.

    `fn` is arbitrary user code (plain JAX); the residual add runs in Pallas.
    Optionally pass `fused_fn`, a callable computing fn(x) + x in one fused
    Pallas kernel (avoids writing/re-reading fn's output through HBM).
    """

    def __init__(self, fn, fused_fn=None):
        self.fn = fn
        self.fused_fn = fused_fn

    def __call__(self, x, **kwargs):
        if self.fused_fn is not None:
            return self.fused_fn(x, **kwargs)
        return residual_add(self.fn(x, **kwargs), x)


if __name__ == "__main__":
    key = jax.random.PRNGKey(0)
    k_x, k_w = jax.random.split(key)

    # Small NCHW input, consistent with a DDPM U-Net feature map.
    N, C, H, W = 2, 4, 16, 16
    x = jax.random.normal(k_x, (N, C, H, W), dtype=jnp.float32)

    # Deterministic example `fn`: a 1x1 conv over channels (weights in-script).
    w = jax.random.normal(k_w, (C, C), dtype=jnp.float32) * 0.1

    def fn(inp):
        return jnp.einsum("oc,nchw->nohw", w, inp)

    ref = fn(x) + x

    # Path 1: generic Residual (fn in plain JAX, residual add in Pallas).
    # Jitted as a whole so the aliased kernel output reuses fn's dead buffer.
    block = Residual(fn)
    out_generic = jax.block_until_ready(jax.jit(block)(x))

    # Path 2: fully fused Pallas kernel (1x1 conv + residual in one HBM pass).
    fused_block = Residual(fn, fused_fn=lambda inp: fused_conv1x1_residual(w, inp))
    out_fused = jax.block_until_ready(jax.jit(fused_block)(x))

    for out in (out_generic, out_fused):
        assert out.shape == x.shape and out.dtype == x.dtype
        assert jnp.allclose(out, ref, atol=1e-5, rtol=1e-5), "mismatch vs reference"
    print("KERNEL_OK")
</pallas_src>

<mosaic_0001>
module attributes {stable_mosaic.version = 11 : i64} {
  func.func @_residual_add_kernel(%arg0: i32, %arg1: memref<16x128xf32, #tpu.memory_space<vmem>>, %arg2: memref<16x128xf32, #tpu.memory_space<vmem>>, %arg3: memref<16x128xf32, #tpu.memory_space<vmem>>) attributes {dimension_semantics = [#tpu.dimension_semantics<parallel>], iteration_bounds = array<i64: 1>, scalar_prefetch = 0 : i64, scratch_operands = 0 : i64, tpu.core_type = #tpu.core_type<tc>, window_params = [{transform_indices = @transform_0, window_bounds = array<i64: 16, 128>}, {transform_indices = @transform_1, window_bounds = array<i64: 16, 128>}, {transform_indices = @transform_2, window_bounds = array<i64: 16, 128>}]} {
    %c0 = arith.constant 0 : index
    %c0_0 = arith.constant 0 : index
    %0 = vector.load %arg1[%c0, %c0_0] : memref<16x128xf32, #tpu.memory_space<vmem>>, vector<16x128xf32>
    %c0_1 = arith.constant 0 : index
    %c0_2 = arith.constant 0 : index
    %1 = vector.load %arg2[%c0_1, %c0_2] : memref<16x128xf32, #tpu.memory_space<vmem>>, vector<16x128xf32>
    %2 = arith.addf %0, %1 : vector<16x128xf32>
    %c0_3 = arith.constant 0 : index
    %c0_4 = arith.constant 0 : index
    %3 = vector.load %arg3[%c0_3, %c0_4] : memref<16x128xf32, #tpu.memory_space<vmem>>, vector<16x128xf32>
    tpu.vector_store %arg3[%c0_3, %c0_4], %2 {strides = array<i32>} : memref<16x128xf32, #tpu.memory_space<vmem>>, vector<16x128xf32>,
    return
  }
  func.func @transform_0(%arg0: i32) -> (i32, i32) {
    %c0_i32 = arith.constant 0 : i32
    %c0_i32_0 = arith.constant 0 : i32
    return %arg0, %c0_i32 : i32, i32
  }
  func.func @transform_1(%arg0: i32) -> (i32, i32) {
    %c0_i32 = arith.constant 0 : i32
    %c0_i32_0 = arith.constant 0 : i32
    return %arg0, %c0_i32 : i32, i32
  }
  func.func @transform_2(%arg0: i32) -> (i32, i32) {
    %c0_i32 = arith.constant 0 : i32
    %c0_i32_0 = arith.constant 0 : i32
    return %arg0, %c0_i32 : i32, i32
  }
}

</mosaic_0001>

<bundles_post_ra>
// kernel: _unnamed_function_.1
= control target key start
LH: loop header
LB: loop body
LE: loop exit
PB: predicated region body
PF: predicated region fallthrough
CT: control target
= control target key end

     0   :  { %s56_s0 = inlined_call_operand.vmem [shape: f32[16,128], index: 0, kind: input, shape index: {}, may-alias: {0,2}]   ;;  %s57_s1 = inlined_call_operand.vmem [shape: f32[16,128], index: 1, kind: input, shape index: {}]   ;;  %s58_s2 = inlined_call_operand.vmem [shape: f32[16,128], index: 2, kind: output, shape index: {}, may-alias: {0,2}]  }
   0x1   :  { %v11_v0 = vld [vmem:[%s56_s0] sm:$0xff]  ;;  %v12_v2 = vld [vmem:[%s56_s0 + $0x8] sm:$0xff] }
   0x2   :  { %v13_v1 = vld [vmem:[%s57_s1] sm:$0xff]  ;;  %v14_v4 = vld [vmem:[%s57_s1 + $0x8] sm:$0xff] }
   0x3   :  { %v15_v3 = vadd.f32 %v13_v1, %v11_v0  ;;  %v16_v5 = vadd.f32 %v14_v4, %v12_v2 }
   0x5   :  { %17 = vst [vmem:[%s58_s2] sm:$0xff] %v15_v3  ;;  %18 = vst [vmem:[%s58_s2 + $0x8] sm:$0xff] %v16_v5 }

</bundles_post_ra>
